<compile_context>
chip_gen: v6e
topology: v6e:2x2x1
jax: 0.10.0
libtpu: 0.0.40
codegen_flags: <defaults>
</compile_context>

<pallas_src>
import jax
import jax.numpy as jnp
from jax.experimental import pallas as pl
from jax.experimental.pallas import tpu as pltpu


_NEG_LARGE = -1e30  # "effectively -inf" for padded class columns (exp -> 0, no NaNs)


def _round_up(x, m):
    return ((x + m - 1) // m) * m


def linear_sm_kernel(x_ref, w_ref, b_ref, o_ref, acc_ref):
    """One (batch-tile, K-tile) grid step of log_softmax(x @ W + b, axis=-1)."""
    k = pl.program_id(1)

    # Fold the bias add into accumulator init (saves a full-tile VPU add later).
    @pl.when(k == 0)
    def _():
        acc_ref[...] = jnp.broadcast_to(b_ref[...], acc_ref.shape).astype(jnp.float32)

    # bf16 MXU operands, f32 accumulation; cast once per tile.
    acc_ref[...] += jnp.dot(
        x_ref[...].astype(jnp.bfloat16),
        w_ref[...].astype(jnp.bfloat16),
        preferred_element_type=jnp.float32,
    )

    # Epilogue only on the last K step: stable log-softmax over the whole
    # (lane-dense, padded) class axis.
    @pl.when(k == pl.num_programs(1) - 1)
    def _():
        logits = acc_ref[...]
        m = jnp.max(logits, axis=-1, keepdims=True)
        shifted = logits - m
        lse = jnp.log(jnp.sum(jnp.exp(shifted), axis=-1, keepdims=True))
        o_ref[...] = (shifted - lse).astype(o_ref.dtype)


def linear_sm(x, weight_t, bias, *, tm=128, tk=512):
    """x: [B, F] f32, weight_t: [F, C] (store the param this way once, not W.T
    per call), bias: [C].  Returns log-probs [B, C] f32."""
    B, F = x.shape
    F_w, C = weight_t.shape
    assert F_w == F and bias.shape == (C,)

    # --- tile sizes (multiples of 8 / 128; modest so double-buffered tiles
    # fit v7x's 64 MiB VMEM without raising vmem_limit_bytes) ---
    TM = min(tm, _round_up(B, 8))
    TK = min(tk, _round_up(F, 128))
    Cp = _round_up(C, 128)          # lane-dense class axis
    Bp = _round_up(B, TM)
    Fp = _round_up(F, TK)

    # --- pad to tile multiples (zeros contribute nothing to the matmul;
    # padded class columns get a hugely negative bias so exp() == 0) ---
    x_p = jnp.pad(x, ((0, Bp - B), (0, Fp - F)))
    w_p = jnp.pad(weight_t, ((0, Fp - F), (0, Cp - C)))
    b_p = jnp.pad(bias, (0, Cp - C), constant_values=_NEG_LARGE).reshape(1, Cp)

    grid = (Bp // TM, Fp // TK)

    cost = pl.CostEstimate(
        flops=2 * Bp * Fp * Cp,
        transcendentals=Bp * Cp + Bp,           # exp per element + log per row
        bytes_accessed=4 * (Bp * Fp + Fp * Cp + Bp * Cp + Cp),
    )

    out_padded = pl.pallas_call(
        linear_sm_kernel,
        out_shape=jax.ShapeDtypeStruct((Bp, Cp), jnp.float32),
        grid_spec=pltpu.PrefetchScalarGridSpec(
            num_scalar_prefetch=0,
            grid=grid,
            in_specs=[
                pl.BlockSpec((TM, TK), lambda i, k: (i, k)),   # x tile
                pl.BlockSpec((TK, Cp), lambda i, k: (k, 0)),   # W tile (batch-invariant)
                pl.BlockSpec((1, Cp), lambda i, k: (0, 0)),    # bias
            ],
            out_specs=pl.BlockSpec((TM, Cp), lambda i, k: (i, 0)),
            scratch_shapes=[pltpu.VMEM((TM, Cp), jnp.float32)],
        ),
        compiler_params=pltpu.CompilerParams(
            dimension_semantics=("parallel", "arbitrary"),
        ),
        cost_estimate=cost,
    )(x_p, w_p, b_p)

    return out_padded[:B, :C]


def reference(x, weight_t, bias):
    # Same bf16-operand matmul as the kernel, f32 accumulate, then log-softmax.
    logits = jnp.dot(
        x.astype(jnp.bfloat16),
        weight_t.astype(jnp.bfloat16),
        preferred_element_type=jnp.float32,
    ) + bias[None, :]
    return jax.nn.log_softmax(logits, axis=1)


if __name__ == "__main__":
    # Small shapes consistent with LinearSM(n_feat, n_cls) on a [B, n_feat] input.
    B, n_feat, n_cls = 8, 32, 16

    key = jax.random.PRNGKey(0)
    kx, kw, kb = jax.random.split(key, 3)

    x = jax.random.normal(kx, (B, n_feat), dtype=jnp.float32)
    # Deterministic synthetic parameters (torch weights_init ~ normal-ish init).
    weight = jax.random.normal(kw, (n_cls, n_feat), dtype=jnp.float32) * 0.02
    bias = jax.random.normal(kb, (n_cls,), dtype=jnp.float32) * 0.01
    # Store the transposed weight once (parameter layout), not per call.
    weight_t = weight.T  # [n_feat, n_cls]

    out = linear_sm(x, weight_t, bias)
    jax.block_until_ready(out)

    ref = reference(x, weight_t, bias)
    assert out.shape == (B, n_cls)
    assert jnp.allclose(out, ref, atol=1e-4, rtol=1e-4), (
        float(jnp.max(jnp.abs(out - ref))))

    print("KERNEL_OK")
</pallas_src>

<mosaic_0001>
module attributes {stable_mosaic.version = 11 : i64} {
  func.func @linear_sm_kernel(%arg0: i32, %arg1: i32, %arg2: memref<8x128xf32, #tpu.memory_space<vmem>>, %arg3: memref<128x128xf32, #tpu.memory_space<vmem>>, %arg4: memref<1x128xf32, #tpu.memory_space<vmem>>, %arg5: memref<8x128xf32, #tpu.memory_space<vmem>>, %arg6: memref<8x128xf32, #tpu.memory_space<vmem>>) attributes {dimension_semantics = [#tpu.dimension_semantics<parallel>, #tpu.dimension_semantics<arbitrary>], iteration_bounds = array<i64: 1, 1>, scalar_prefetch = 0 : i64, scratch_operands = 1 : i64, tpu.core_type = #tpu.core_type<tc>, window_params = [{transform_indices = @transform_0, window_bounds = array<i64: 8, 128>}, {transform_indices = @transform_1, window_bounds = array<i64: 128, 128>}, {pipeline_mode = #tpu.pipeline_mode<synchronous>, transform_indices = @transform_2, window_bounds = array<i64: 1, 128>}, {transform_indices = @transform_3, window_bounds = array<i64: 8, 128>}]} {
    %c0_i32 = arith.constant 0 : i32
    %0 = arith.cmpi eq, %arg1, %c0_i32 : i32
    %1 = arith.extui %0 : i1 to i32
    %c0_i32_0 = arith.constant 0 : i32
    %2 = arith.cmpi ne, %1, %c0_i32_0 : i32
    scf.if %2 {
      %c0_10 = arith.constant 0 : index
      %c0_11 = arith.constant 0 : index
      %14 = vector.load %arg4[%c0_10, %c0_11] : memref<1x128xf32, #tpu.memory_space<vmem>>, vector<1x128xf32>
      %15 = vector.shape_cast %14 : vector<1x128xf32> to vector<1x128xf32>
      %16 = vector.broadcast %15 : vector<1x128xf32> to vector<8x128xf32>
      %c0_12 = arith.constant 0 : index
      %c0_13 = arith.constant 0 : index
      %17 = vector.load %arg6[%c0_12, %c0_13] : memref<8x128xf32, #tpu.memory_space<vmem>>, vector<8x128xf32>
      tpu.vector_store %arg6[%c0_12, %c0_13], %16 {strides = array<i32>} : memref<8x128xf32, #tpu.memory_space<vmem>>, vector<8x128xf32>,
    } else {
    }
    %c0 = arith.constant 0 : index
    %c0_1 = arith.constant 0 : index
    %3 = vector.load %arg6[%c0, %c0_1] : memref<8x128xf32, #tpu.memory_space<vmem>>, vector<8x128xf32>
    %c0_2 = arith.constant 0 : index
    %c0_3 = arith.constant 0 : index
    %4 = vector.load %arg2[%c0_2, %c0_3] : memref<8x128xf32, #tpu.memory_space<vmem>>, vector<8x128xf32>
    %5 = arith.truncf %4 : vector<8x128xf32> to vector<8x128xbf16>
    %c0_4 = arith.constant 0 : index
    %c0_5 = arith.constant 0 : index
    %6 = vector.load %arg3[%c0_4, %c0_5] : memref<128x128xf32, #tpu.memory_space<vmem>>, vector<128x128xf32>
    %7 = arith.truncf %6 : vector<128x128xf32> to vector<128x128xbf16>
    %cst = arith.constant dense<0.000000e+00> : vector<8x128xf32>
    %8 = tpu.matmul %5, %7, %cst {dimension_numbers = #tpu.dot_dimension_numbers<[1], [0], [0], [1], [0, 0, 1, 1], [], []>} : vector<8x128xbf16>, vector<128x128xbf16>, vector<8x128xf32> -> vector<8x128xf32>
    %9 = arith.addf %3, %8 : vector<8x128xf32>
    %c0_6 = arith.constant 0 : index
    %c0_7 = arith.constant 0 : index
    %10 = vector.load %arg6[%c0_6, %c0_7] : memref<8x128xf32, #tpu.memory_space<vmem>>, vector<8x128xf32>
    tpu.vector_store %arg6[%c0_6, %c0_7], %9 {strides = array<i32>} : memref<8x128xf32, #tpu.memory_space<vmem>>, vector<8x128xf32>,
    %c0_i32_8 = arith.constant 0 : i32
    %11 = arith.cmpi eq, %arg1, %c0_i32_8 : i32
    %12 = arith.extui %11 : i1 to i32
    %c0_i32_9 = arith.constant 0 : i32
    %13 = arith.cmpi ne, %12, %c0_i32_9 : i32
    scf.if %13 {
      %c0_10 = arith.constant 0 : index
      %c0_11 = arith.constant 0 : index
      %14 = vector.load %arg6[%c0_10, %c0_11] : memref<8x128xf32, #tpu.memory_space<vmem>>, vector<8x128xf32>
      %cst_12 = arith.constant dense<0xFF800000> : vector<8xf32>
      %15 = vector.multi_reduction <maximumf>, %14, %cst_12 [1] : vector<8x128xf32> to vector<8xf32>
      %16 = vector.shape_cast %15 : vector<8xf32> to vector<8x1xf32>
      %17 = vector.broadcast %16 : vector<8x1xf32> to vector<8x128xf32>
      %18 = arith.subf %14, %17 : vector<8x128xf32>
      %19 = math.exp %18 : vector<8x128xf32>
      %cst_13 = arith.constant dense<0.000000e+00> : vector<8xf32>
      %20 = vector.multi_reduction <add>, %19, %cst_13 [1] : vector<8x128xf32> to vector<8xf32>
      %21 = vector.shape_cast %20 : vector<8xf32> to vector<8x1xf32>
      %22 = math.log %21 : vector<8x1xf32>
      %23 = vector.broadcast %22 : vector<8x1xf32> to vector<8x128xf32>
      %24 = arith.subf %18, %23 : vector<8x128xf32>
      %c0_14 = arith.constant 0 : index
      %c0_15 = arith.constant 0 : index
      %25 = vector.load %arg5[%c0_14, %c0_15] : memref<8x128xf32, #tpu.memory_space<vmem>>, vector<8x128xf32>
      tpu.vector_store %arg5[%c0_14, %c0_15], %24 {strides = array<i32>} : memref<8x128xf32, #tpu.memory_space<vmem>>, vector<8x128xf32>,
    } else {
    }
    return
  }
  func.func @transform_0(%arg0: i32, %arg1: i32) -> (i32, i32) {
    %c0_i32 = arith.constant 0 : i32
    return %arg0, %arg1 : i32, i32
  }
  func.func @transform_1(%arg0: i32, %arg1: i32) -> (i32, i32) {
    %c0_i32 = arith.constant 0 : i32
    %c0_i32_0 = arith.constant 0 : i32
    return %arg1, %c0_i32 : i32, i32
  }
  func.func @transform_2(%arg0: i32, %arg1: i32) -> (i32, i32) {
    %c0_i32 = arith.constant 0 : i32
    %c0_i32_0 = arith.constant 0 : i32
    %c0_i32_1 = arith.constant 0 : i32
    return %c0_i32, %c0_i32_0 : i32, i32
  }
  func.func @transform_3(%arg0: i32, %arg1: i32) -> (i32, i32) {
    %c0_i32 = arith.constant 0 : i32
    %c0_i32_0 = arith.constant 0 : i32
    return %arg0, %c0_i32 : i32, i32
  }
}

</mosaic_0001>

<bundles_post_ra>
// kernel: tpu_custom_call.1
= control target key start
LH: loop header
LB: loop body
LE: loop exit
PB: predicated region body
PF: predicated region fallthrough
CT: control target
= control target key end

     0   :  { %8 = vsyncpa [#allocation4], 0  ;;  %s300_s0 = inlined_call_operand.hbm [shape: f32[8,128], index: 0, kind: input, shape index: {}]   ;;  %s301_s1 = inlined_call_operand.hbm [shape: f32[128,128], index: 1, kind: input, shape index: {}]   ;;  %s302_s2 = inlined_call_operand.vmem [shape: f32[1,128], index: 2, kind: input, shape index: {}]   ;;  %s303_s3 = inlined_call_operand.hbm [shape: f32[8,128], index: 3, kind: output, shape index: {}]  }
   0x1   :  { %9 = vsyncpa [#allocation7], 0 }
   0x2   :  { %10 = vsyncpa [#allocation5], 0  ;;  %s261_s12 = smov [#allocation3]   ;;  %s262_s14 = smov [#allocation6]  }
   0x3   :  { %s17_s13 = sshll.u32 %s261_s12, 4  ;;  %s26_s15 = sshll.u32 %s262_s14, 4  ;;  %s18_s13 = int_to_ptr.vmem [resolvable:$true] %s17_s13  ;;  %s27_s15 = int_to_ptr.vmem [resolvable:$true] %s26_s15 }
   0x4   :  { %s203_s16 = scalar_lea.vmem %s18_s13, 128  ;;  %p208_p1 = scmp.lt.s32.totalorder %s18_s13, %s18_s13 }
   0x5   :  { %p204_p0 = scmp.ne.s32.totalorder %s18_s13, %s203_s16  ;;  %p209_p2 = scmp.lt.s32.totalorder %s203_s16, %s203_s16 }
   0x7   :  { %p210_p3 = por %p209_p2, %p208_p1 }
   0x9   :  { %p211_p4 = pnand %p210_p3, %p204_p0 }
   0xb   :  { %214 = shalt.err (!%p211_p4)
}
   0xc   :  { %20 = dma.hbm_to_vmem [thread:$0]  %s300_s0, 128, %s18_s13, [#allocation4]  }
   0xd   :  { %s223_s19 = scalar_lea.vmem %s27_s15, 2048  ;;  %p228_p6 = scmp.lt.s32.totalorder %s27_s15, %s27_s15 }
   0xe   :  { %p224_p5 = scmp.ne.s32.totalorder %s27_s15, %s223_s19  ;;  %p229_p7 = scmp.lt.s32.totalorder %s223_s19, %s223_s19 }
  0x10   :  { %p230_p8 = por %p229_p7, %p228_p6 }
  0x12   :  { %p231_p9 = pnand %p230_p8, %p224_p5 }
  0x14   :  { %234 = shalt.err (!%p231_p9)
}
  0x15   :  { %s263_s20 = smov 128   ;;  %s264_s21 = smov 8  }
  0x16   :  { %32 = dma.hbm_to_vmem [thread:$0]  %s301_s1, 2048, %s27_s15, [#allocation7], %s263_s20, %s263_s20, %s264_s21  }
  0x17   :  { %255 = dma.done.wait [#allocation4], 128  }
  0x18   :  { %256 = vsyncadd [#allocation4], 4294967168 }
  0x19   :  { %257 = dma.done.wait [#allocation7], 2048  }
  0x1a   :  { %258 = vsyncadd [#allocation7], 4294965248  ;;  %v265_v0 = vmov 0.0   ;;  %vm266_vm0 = vmmov 0   ;;  %v71_v1 = vld [vmem:[#allocation6 + $0x70] sm:$0xff]  ;;  %v72_v2 = vld [vmem:[#allocation6 + $0x78] sm:$0xff] }
  0x1b   :  { %164 = vmatprep.subr.bf16.mxu0 %v265_v0  ;;  %180 = vmatprep.mubr.msk.bf16.mxu0 %vm266_vm0, %v265_v0  ;;  %v69_v3 = vld [vmem:[#allocation6 + $0x60] sm:$0xff]  ;;  %v80_v4 = vpack.c.bf16 %v72_v2, %v71_v1  ;;  %v70_v5 = vld [vmem:[#allocation6 + $0x68] sm:$0xff]  ;;  %v67_v7 = vld [vmem:[#allocation6 + $0x50] sm:$0xff]  ;;  %s267_s24 = smov [#allocation8]  }
  0x1c   :  { %v79_v6 = vpack.c.bf16 %v70_v5, %v69_v3  ;;  %v68_v8 = vld [vmem:[#allocation6 + $0x58] sm:$0xff]  ;;  %v65_v10 = vld [vmem:[#allocation6 + $0x40] sm:$0xff]  ;;  %v66_v11 = vld [vmem:[#allocation6 + $0x48] sm:$0xff]  ;;  %s144_s25 = sshll.u32 %s267_s24, 4  ;;  %s145_s25 = int_to_ptr.vmem [resolvable:$true] %s144_s25 }
  0x1d   :  { %165 = vmatpush3.bf16.msra.mxu0 %v80_v4  ;;  %v78_v9 = vpack.c.bf16 %v68_v8, %v67_v7  ;;  %v77_v12 = vpack.c.bf16 %v66_v11, %v65_v10  ;;  %v63_v13 = vld [vmem:[#allocation6 + $0x30] sm:$0xff]  ;;  %v64_v14 = vld [vmem:[#allocation6 + $0x38] sm:$0xff]  ;;  %v61_v16 = vld [vmem:[#allocation6 + $0x20] sm:$0xff]  ;;  %p240_p11 = scmp.lt.s32.totalorder %s145_s25, %s145_s25 }
  0x1e   :  { %166 = vmatprep.subr.bf16.mxu0 %v265_v0  ;;  %v76_v15 = vpack.c.bf16 %v64_v14, %v63_v13  ;;  %v62_v17 = vld [vmem:[#allocation6 + $0x28] sm:$0xff]  ;;  %v59_v19 = vld [vmem:[#allocation6 + $0x10] sm:$0xff]  ;;  %v60_v20 = vld [vmem:[#allocation6 + $0x18] sm:$0xff] }
  0x1f   :  { %v75_v18 = vpack.c.bf16 %v62_v17, %v61_v16  ;;  %v74_v21 = vpack.c.bf16 %v60_v20, %v59_v19  ;;  %v57_v22 = vld [vmem:[#allocation6] sm:$0xff]  ;;  %v58_v23 = vld [vmem:[#allocation6 + $0x8] sm:$0xff]  ;;  %v55_v25 = vld [vmem:[#allocation3] sm:$0xff] }
  0x20   :  { %v73_v24 = vpack.c.bf16 %v58_v23, %v57_v22  ;;  %v56_v26 = vpack.c.bf16 %v55_v25, %v55_v25  ;;  %v154_v27 = vld [vmem:[%s302_s2] ss:$0 sm:$0xff]  ;;  %s235_s2 = scalar_lea.vmem %s145_s25, 128 }
  0x21   :  { %167 = vmatpush3.bf16.msra.mxu0 %v79_v6  ;;  %p236_p10 = scmp.ne.s32.totalorder %s145_s25, %s235_s2  ;;  %p241_p12 = scmp.lt.s32.totalorder %s235_s2, %s235_s2 }
  0x22   :  { %168 = vmatprep.subr.bf16.mxu0 %v265_v0 }
  0x23   :  { %p242_p13 = por %p241_p12, %p240_p11 }
  0x25   :  { %169 = vmatpush3.bf16.msra.mxu0 %v78_v9  ;;  %p243_p0 = pnand %p242_p13, %p236_p10 }
  0x26   :  { %170 = vmatprep.subr.bf16.mxu0 %v265_v0 }
  0x29   :  { %171 = vmatpush3.bf16.msra.mxu0 %v77_v12 }
  0x2a   :  { %172 = vmatprep.subr.bf16.mxu0 %v265_v0 }
  0x2d   :  { %173 = vmatpush3.bf16.msra.mxu0 %v76_v15 }
  0x2e   :  { %174 = vmatprep.subr.bf16.mxu0 %v265_v0 }
  0x31   :  { %175 = vmatpush3.bf16.msra.mxu0 %v75_v18 }
  0x32   :  { %176 = vmatprep.subr.bf16.mxu0 %v265_v0 }
  0x35   :  { %177 = vmatpush3.bf16.msra.mxu0 %v74_v21 }
  0x36   :  { %178 = vmatprep.subr.bf16.mxu0 %v265_v0 }
  0x39   :  { %179 = vmatpush3.bf16.msra.mxu0 %v73_v24 }
  0x3c   :  { %181 = vmatmul.mubr.bf16.vlgmr.msra.gmra.mxu0 %v56_v26 }
  0xfc   :  { %v115_v28 = vpop.f32.mrf.mxu0 }
  0xfd   :  { %v121_v29 = vadd.f32 %v154_v27, %v115_v28 }
  0xfe   :  { %v182_v30 = vpop.f32.mrf.mxu0 }
  0xff   :  { %127 = vmax.xlane.f32.xlu0 %v121_v29 }
 0x100   :  { %v118_v31 = vpop.f32.mrf.mxu0 }
 0x102   :  { %v183_v32 = vpop.f32.mrf.mxu0 }
 0x188   :  { %v128_v33 = vpop.xlane.xlu0 %127 }
 0x189   :  { %v129_v34 = vsub.f32 %v121_v29, %v128_v33 }
 0x18b   :  { %v130_v35 = vmul.f32 1.442695, %v129_v34 }
 0x18d   :  { %191 = vpow2.f32 %v130_v35 }
 0x19a   :  { %v192_v36 = vpop.eup %191 }
 0x19b   :  { %132 = vadd.xlane.f32.xlu0 %v192_v36 }
 0x224   :  { %v133_v37 = vpop.xlane.xlu0 %132 }
 0x225   :  { %193 = vlog2.f32 %v133_v37 }
 0x232   :  { %v194_v38 = vpop.eup %193 }
 0x233   :  { %v135_v39 = vmul.f32 0.6931472, %v194_v38 }
 0x235   :  { %v136_v40 = vsub.f32 %v129_v34, %v135_v39 }
 0x237   :  { %137 = vst [vmem:[#allocation8] sm:$0xff] %v136_v40 }
 0x238   :  { %246 = shalt.err (!%p243_p0)
}
 0x239   :  { %147 = dma.vmem_to_hbm [thread:$0]  %s145_s25, 128, %s303_s3, [#allocation5]  }
 0x23a   :  { %259 = dma.done.wait [#allocation5], 128  }
 0x23b   :  { %260 = vsyncadd [#allocation5], 4294967168 }
 0x23c   :  { %151 = vsyncpa [#allocation4], 1 }
 0x23d   :  { %152 = vsyncpa [#allocation7], 1 }
 0x23e   :  { %153 = vsyncpa [#allocation5], 1 }

</bundles_post_ra>
